<compile_context>
chip_gen: v5e
topology: v5e:2x2
jax: 0.10.0
libtpu: 0.0.40
codegen_flags: <defaults>
</compile_context>

<pallas_src>
import functools
import numpy as np
import jax
import jax.numpy as jnp
from jax.experimental import pallas as pl
from jax.experimental.pallas import tpu as pltpu


# ---------------------------------------------------------------------------
# Pallas kernels
# ---------------------------------------------------------------------------
def conv_stats_kernel(a_ref, b_ref, o_ref, sum_ref, sq_ref):
    """One M-tile of the lane-packed im2col matmul, fused with per-tile
    per-sublane partial channel sums / sums-of-squares for BatchNorm."""
    y = jnp.dot(a_ref[...], b_ref[...], preferred_element_type=jnp.float32)
    o_ref[...] = y
    rows, lanes = y.shape
    # Per-sublane partial reduction (pure vadds across vreg rows, no XLU sweep);
    # the remaining (8, lane-group) fold is a tiny JAX op outside the kernel.
    yp = y.reshape(rows // 8, 8, lanes)
    sum_ref[...] = jnp.sum(yp, axis=0)[None]
    sq_ref[...] = jnp.sum(yp * yp, axis=0)[None]


def bn_act_kernel(x_ref, scale_ref, bias_ref, o_ref, *, slope):
    """Fused BatchNorm affine apply + LeakyReLU (slope=1.0 -> identity)."""
    y = x_ref[...] * scale_ref[...] + bias_ref[...]
    o_ref[...] = jnp.where(y > 0, y, slope * y)


# ---------------------------------------------------------------------------
# Glue (im2col, weight packing) in plain JAX
# ---------------------------------------------------------------------------
def im2col(x_nhwc, kh, kw, stride, pad):
    N, H, W, C = x_nhwc.shape
    xp = jnp.pad(x_nhwc, ((0, 0), (pad, pad), (pad, pad), (0, 0)))
    OH = (H + 2 * pad - kh) // stride + 1
    OW = (W + 2 * pad - kw) // stride + 1
    cols = [xp[:, i:i + stride * OH:stride, j:j + stride * OW:stride, :]
            for i in range(kh) for j in range(kw)]
    a = jnp.stack(cols, axis=3)            # (N, OH, OW, KH*KW, C)
    # No minor-dim transpose of the expanded tensor: columns stay in (i, j, c)
    # order; the tiny weight is reordered to match instead.
    return a.reshape(N * OH * OW, kh * kw * C), OH, OW


def _pick_row_tile(nrows, cap):
    """Largest multiple of 8 <= cap that divides nrows (nrows is a multiple of 8)."""
    if nrows <= cap:
        return nrows
    t = (cap // 8) * 8
    while t >= 8:
        if nrows % t == 0:
            return t
        t -= 8
    return nrows


# ---------------------------------------------------------------------------
# Forward
# ---------------------------------------------------------------------------
def basic_conv_forward(x_nchw, weight, *, stride=1, pad=1, use_bn=True, relu=True,
                       eps=1e-5, gamma=None, beta=None, tm=512, bn_tile=1024):
    """BasicConv forward. x_nchw: (N, C, H, W); weight: (OC, C, KH, KW)."""
    OC, C, KH, KW = weight.shape
    N = x_nchw.shape[0]

    x_nhwc = jnp.transpose(x_nchw, (0, 2, 3, 1)).astype(jnp.float32)
    a, OH, OW = im2col(x_nhwc, KH, KW, stride, pad)          # (M, K) f32
    M, K = a.shape

    # Weight as (K, OC) in (kh, kw, c) column order (matches im2col stacking).
    b = jnp.transpose(weight, (2, 3, 1, 0)).reshape(K, OC).astype(jnp.float32)

    # Lane packing: fold G = 128 // OC consecutive output rows into one
    # 128-lane-wide row so every store in the pipeline is unmasked/lane-dense.
    G = 128 // OC if (OC < 128 and 128 % OC == 0) else 1
    L = G * OC

    # M tile: multiple of 8*G rows (=> wide tile rows are a multiple of 8).
    tm = max(tm, 8 * G)
    tm = ((tm + 8 * G - 1) // (8 * G)) * (8 * G)
    n_tiles = pl.cdiv(M, tm)
    M_pad = n_tiles * tm
    if M_pad != M:
        # Zero rows: contribute 0 to both sum and sum-of-squares -> stats stay exact.
        a = jnp.pad(a, ((0, M_pad - M), (0, 0)))

    tm_w = tm // G            # wide rows per tile
    Mw = M_pad // G           # total wide rows

    # bf16 MXU operands (f32 accumulation); wide views are free contiguous reshapes.
    a_wide = a.astype(jnp.bfloat16).reshape(Mw, G * K)
    b_big = jnp.kron(jnp.eye(G, dtype=jnp.float32), b).astype(jnp.bfloat16)  # (G*K, L)

    # NOTE(v7x): per-tile VMEM here is a few hundred KiB; for realistic BasicConv
    # sizes (K = C*KH*KW in the thousands) cap tm so 2x(tm_w x G*K) bf16 buffers
    # fit the 32 MiB default scoped VMEM, or raise vmem_limit_bytes explicitly.
    conv_wide, psum, psq = pl.pallas_call(
        conv_stats_kernel,
        out_shape=(jax.ShapeDtypeStruct((Mw, L), jnp.float32),
                   jax.ShapeDtypeStruct((n_tiles, 8, L), jnp.float32),
                   jax.ShapeDtypeStruct((n_tiles, 8, L), jnp.float32)),
        grid=(n_tiles,),
        in_specs=[
            pl.BlockSpec((tm_w, G * K), lambda i: (i, 0)),
            pl.BlockSpec((G * K, L), lambda i: (0, 0)),
        ],
        out_specs=(pl.BlockSpec((tm_w, L), lambda i: (i, 0)),
                   pl.BlockSpec((1, 8, L), lambda i: (i, 0, 0)),
                   pl.BlockSpec((1, 8, L), lambda i: (i, 0, 0))),
        compiler_params=pltpu.CompilerParams(
            dimension_semantics=("parallel",)),
    )(a_wide, b_big)

    if use_bn:
        ch_sum = psum.sum(axis=(0, 1)).reshape(G, OC).sum(axis=0)   # (OC,)
        ch_sq = psq.sum(axis=(0, 1)).reshape(G, OC).sum(axis=0)
        mean = ch_sum / M
        # TODO(synk): E[x^2] - E[x]^2 can cancel for very large M / activation
        # magnitudes; switch to a compensated or two-pass variance if needed.
        var = ch_sq / M - mean * mean
        g = jnp.ones((OC,), jnp.float32) if gamma is None else gamma.astype(jnp.float32)
        bt = jnp.zeros((OC,), jnp.float32) if beta is None else beta.astype(jnp.float32)
        scale = g / jnp.sqrt(var + eps)
        bias = bt - mean * scale
    else:
        scale = jnp.ones((OC,), jnp.float32)
        bias = jnp.zeros((OC,), jnp.float32)

    if use_bn or relu:
        # Tile scale/bias across the G packed channel groups -> (1, 128) lane-dense.
        scale_w = jnp.tile(scale, G).reshape(1, L)
        bias_w = jnp.tile(bias, G).reshape(1, L)
        slope = 0.01 if relu else 1.0          # slope=1.0 -> pure BN (identity activation)
        tbn = _pick_row_tile(Mw, bn_tile)
        y_wide = pl.pallas_call(
            functools.partial(bn_act_kernel, slope=float(slope)),
            out_shape=jax.ShapeDtypeStruct((Mw, L), jnp.float32),
            grid=(Mw // tbn,),
            in_specs=[
                pl.BlockSpec((tbn, L), lambda i: (i, 0)),
                pl.BlockSpec((1, L), lambda i: (0, 0)),
                pl.BlockSpec((1, L), lambda i: (0, 0)),
            ],
            out_specs=pl.BlockSpec((tbn, L), lambda i: (i, 0)),
            input_output_aliases={0: 0},       # normalize/activate in place
            compiler_params=pltpu.CompilerParams(
                dimension_semantics=("parallel",)),
        )(conv_wide, scale_w, bias_w)
    else:
        y_wide = conv_wide

    out = y_wide.reshape(M_pad, OC)[:M].reshape(N, OH, OW, OC)
    return jnp.transpose(out, (0, 3, 1, 2))    # back to NCHW


# ---------------------------------------------------------------------------
# Pure-JAX reference (same bf16 MXU operands, f32 accumulation)
# ---------------------------------------------------------------------------
def reference_forward(x_nchw, weight, *, stride=1, pad=1, eps=1e-5, slope=0.01):
    out = jax.lax.conv_general_dilated(
        x_nchw.astype(jnp.bfloat16), weight.astype(jnp.bfloat16),
        window_strides=(stride, stride), padding=[(pad, pad), (pad, pad)],
        dimension_numbers=("NCHW", "OIHW", "NCHW"),
        preferred_element_type=jnp.float32)
    mean = out.mean(axis=(0, 2, 3), keepdims=True)
    var = out.var(axis=(0, 2, 3), keepdims=True)
    out = (out - mean) / jnp.sqrt(var + eps)
    return jnp.where(out > 0, out, slope * out)


if __name__ == "__main__":
    key = jax.random.PRNGKey(0)
    kx, kw = jax.random.split(key)

    N, C_in, H, W = 2, 4, 16, 16
    C_out, KH, KW = 8, 3, 3

    x = jax.random.normal(kx, (N, C_in, H, W), dtype=jnp.float32)
    # Deterministic Conv2d weight init (Kaiming-uniform-like bound).
    bound = 1.0 / np.sqrt(C_in * KH * KW)
    weight = jax.random.uniform(kw, (C_out, C_in, KH, KW),
                                minval=-bound, maxval=bound, dtype=jnp.float32)

    fwd = jax.jit(lambda xx, ww: basic_conv_forward(xx, ww, stride=1, pad=1))
    out = jax.block_until_ready(fwd(x, weight))

    ref = jax.block_until_ready(reference_forward(x, weight, stride=1, pad=1))
    assert out.shape == (N, C_out, H, W)
    np.testing.assert_allclose(np.asarray(out), np.asarray(ref), rtol=2e-3, atol=2e-3)

    print("KERNEL_OK")
</pallas_src>

<mosaic_0001>
module attributes {stable_mosaic.version = 11 : i64} {
  func.func @conv_stats_kernel(%arg0: i32, %arg1: memref<32x576xbf16, #tpu.memory_space<vmem>>, %arg2: memref<576x128xbf16, #tpu.memory_space<vmem>>, %arg3: memref<32x128xf32, #tpu.memory_space<vmem>>, %arg4: memref<1x8x128xf32, #tpu.memory_space<vmem>>, %arg5: memref<1x8x128xf32, #tpu.memory_space<vmem>>) attributes {dimension_semantics = [#tpu.dimension_semantics<parallel>], iteration_bounds = array<i64: 1>, scalar_prefetch = 0 : i64, scratch_operands = 0 : i64, tpu.core_type = #tpu.core_type<tc>, window_params = [{transform_indices = @transform_0, window_bounds = array<i64: 32, 576>}, {pipeline_mode = #tpu.pipeline_mode<synchronous>, transform_indices = @transform_1, window_bounds = array<i64: 576, 128>}, {transform_indices = @transform_2, window_bounds = array<i64: 32, 128>}, {transform_indices = @transform_3, window_bounds = array<i64: 1, 8, 128>}, {transform_indices = @transform_4, window_bounds = array<i64: 1, 8, 128>}]} {
    %c0 = arith.constant 0 : index
    %c0_0 = arith.constant 0 : index
    %0 = vector.load %arg1[%c0, %c0_0] : memref<32x576xbf16, #tpu.memory_space<vmem>>, vector<32x576xbf16>
    %c0_1 = arith.constant 0 : index
    %c0_2 = arith.constant 0 : index
    %1 = vector.load %arg2[%c0_1, %c0_2] : memref<576x128xbf16, #tpu.memory_space<vmem>>, vector<576x128xbf16>
    %cst = arith.constant dense<0.000000e+00> : vector<32x128xf32>
    %2 = tpu.matmul %0, %1, %cst {dimension_numbers = #tpu.dot_dimension_numbers<[1], [0], [0], [1], [0, 0, 1, 1], [], []>} : vector<32x576xbf16>, vector<576x128xbf16>, vector<32x128xf32> -> vector<32x128xf32>
    %c0_3 = arith.constant 0 : index
    %c0_4 = arith.constant 0 : index
    %3 = vector.load %arg3[%c0_3, %c0_4] : memref<32x128xf32, #tpu.memory_space<vmem>>, vector<32x128xf32>
    tpu.vector_store %arg3[%c0_3, %c0_4], %2 {strides = array<i32>} : memref<32x128xf32, #tpu.memory_space<vmem>>, vector<32x128xf32>,
    %4 = vector.shape_cast %2 : vector<32x128xf32> to vector<4x8x128xf32>
    %cst_5 = arith.constant dense<0.000000e+00> : vector<8x128xf32>
    %5 = vector.multi_reduction <add>, %4, %cst_5 [0] : vector<4x8x128xf32> to vector<8x128xf32>
    %6 = vector.shape_cast %5 : vector<8x128xf32> to vector<1x8x128xf32>
    %c0_6 = arith.constant 0 : index
    %c0_7 = arith.constant 0 : index
    %c0_8 = arith.constant 0 : index
    %7 = vector.load %arg4[%c0_6, %c0_7, %c0_8] : memref<1x8x128xf32, #tpu.memory_space<vmem>>, vector<1x8x128xf32>
    tpu.vector_store %arg4[%c0_6, %c0_7, %c0_8], %6 {strides = array<i32>} : memref<1x8x128xf32, #tpu.memory_space<vmem>>, vector<1x8x128xf32>,
    %8 = arith.mulf %4, %4 : vector<4x8x128xf32>
    %cst_9 = arith.constant dense<0.000000e+00> : vector<8x128xf32>
    %9 = vector.multi_reduction <add>, %8, %cst_9 [0] : vector<4x8x128xf32> to vector<8x128xf32>
    %10 = vector.shape_cast %9 : vector<8x128xf32> to vector<1x8x128xf32>
    %c0_10 = arith.constant 0 : index
    %c0_11 = arith.constant 0 : index
    %c0_12 = arith.constant 0 : index
    %11 = vector.load %arg5[%c0_10, %c0_11, %c0_12] : memref<1x8x128xf32, #tpu.memory_space<vmem>>, vector<1x8x128xf32>
    tpu.vector_store %arg5[%c0_10, %c0_11, %c0_12], %10 {strides = array<i32>} : memref<1x8x128xf32, #tpu.memory_space<vmem>>, vector<1x8x128xf32>,
    return
  }
  func.func @transform_0(%arg0: i32) -> (i32, i32) {
    %c0_i32 = arith.constant 0 : i32
    %c0_i32_0 = arith.constant 0 : i32
    return %arg0, %c0_i32 : i32, i32
  }
  func.func @transform_1(%arg0: i32) -> (i32, i32) {
    %c0_i32 = arith.constant 0 : i32
    %c0_i32_0 = arith.constant 0 : i32
    %c0_i32_1 = arith.constant 0 : i32
    return %c0_i32, %c0_i32_0 : i32, i32
  }
  func.func @transform_2(%arg0: i32) -> (i32, i32) {
    %c0_i32 = arith.constant 0 : i32
    %c0_i32_0 = arith.constant 0 : i32
    return %arg0, %c0_i32 : i32, i32
  }
  func.func @transform_3(%arg0: i32) -> (i32, i32, i32) {
    %c0_i32 = arith.constant 0 : i32
    %c0_i32_0 = arith.constant 0 : i32
    %c0_i32_1 = arith.constant 0 : i32
    return %arg0, %c0_i32, %c0_i32_0 : i32, i32, i32
  }
  func.func @transform_4(%arg0: i32) -> (i32, i32, i32) {
    %c0_i32 = arith.constant 0 : i32
    %c0_i32_0 = arith.constant 0 : i32
    %c0_i32_1 = arith.constant 0 : i32
    return %arg0, %c0_i32, %c0_i32_0 : i32, i32, i32
  }
}

module attributes {stable_mosaic.version = 11 : i64} {
  func.func @bn_act_kernel(%arg0: i32, %arg1: memref<32x128xf32, #tpu.memory_space<vmem>>, %arg2: memref<1x128xf32, #tpu.memory_space<vmem>>, %arg3: memref<1x128xf32, #tpu.memory_space<vmem>>, %arg4: memref<32x128xf32, #tpu.memory_space<vmem>>) attributes {dimension_semantics = [#tpu.dimension_semantics<parallel>], iteration_bounds = array<i64: 1>, scalar_prefetch = 0 : i64, scratch_operands = 0 : i64, tpu.core_type = #tpu.core_type<tc>, window_params = [{transform_indices = @transform_0, window_bounds = array<i64: 32, 128>}, {pipeline_mode = #tpu.pipeline_mode<synchronous>, transform_indices = @transform_1, window_bounds = array<i64: 1, 128>}, {pipeline_mode = #tpu.pipeline_mode<synchronous>, transform_indices = @transform_2, window_bounds = array<i64: 1, 128>}, {transform_indices = @transform_3, window_bounds = array<i64: 32, 128>}]} {
    %c0 = arith.constant 0 : index
    %c0_0 = arith.constant 0 : index
    %0 = vector.load %arg1[%c0, %c0_0] : memref<32x128xf32, #tpu.memory_space<vmem>>, vector<32x128xf32>
    %c0_1 = arith.constant 0 : index
    %c0_2 = arith.constant 0 : index
    %1 = vector.load %arg2[%c0_1, %c0_2] : memref<1x128xf32, #tpu.memory_space<vmem>>, vector<1x128xf32>
    %2 = vector.broadcast %1 : vector<1x128xf32> to vector<32x128xf32>
    %3 = arith.mulf %0, %2 : vector<32x128xf32>
    %c0_3 = arith.constant 0 : index
    %c0_4 = arith.constant 0 : index
    %4 = vector.load %arg3[%c0_3, %c0_4] : memref<1x128xf32, #tpu.memory_space<vmem>>, vector<1x128xf32>
    %5 = vector.broadcast %4 : vector<1x128xf32> to vector<32x128xf32>
    %6 = arith.addf %3, %5 : vector<32x128xf32>
    %cst = arith.constant 0.000000e+00 : f32
    %7 = vector.broadcast %cst : f32 to vector<32x128xf32>
    %8 = arith.cmpf ogt, %6, %7 : vector<32x128xf32>
    %cst_5 = arith.constant 0.00999999977 : f32
    %9 = vector.broadcast %cst_5 : f32 to vector<32x128xf32>
    %10 = arith.mulf %9, %6 : vector<32x128xf32>
    %11 = arith.select %8, %6, %10 : vector<32x128xi1>, vector<32x128xf32>
    %c0_6 = arith.constant 0 : index
    %c0_7 = arith.constant 0 : index
    %12 = vector.load %arg4[%c0_6, %c0_7] : memref<32x128xf32, #tpu.memory_space<vmem>>, vector<32x128xf32>
    tpu.vector_store %arg4[%c0_6, %c0_7], %11 {strides = array<i32>} : memref<32x128xf32, #tpu.memory_space<vmem>>, vector<32x128xf32>,
    return
  }
  func.func @transform_0(%arg0: i32) -> (i32, i32) {
    %c0_i32 = arith.constant 0 : i32
    %c0_i32_0 = arith.constant 0 : i32
    return %arg0, %c0_i32 : i32, i32
  }
  func.func @transform_1(%arg0: i32) -> (i32, i32) {
    %c0_i32 = arith.constant 0 : i32
    %c0_i32_0 = arith.constant 0 : i32
    %c0_i32_1 = arith.constant 0 : i32
    return %c0_i32, %c0_i32_0 : i32, i32
  }
  func.func @transform_2(%arg0: i32) -> (i32, i32) {
    %c0_i32 = arith.constant 0 : i32
    %c0_i32_0 = arith.constant 0 : i32
    %c0_i32_1 = arith.constant 0 : i32
    return %c0_i32, %c0_i32_0 : i32, i32
  }
  func.func @transform_3(%arg0: i32) -> (i32, i32) {
    %c0_i32 = arith.constant 0 : i32
    %c0_i32_0 = arith.constant 0 : i32
    return %arg0, %c0_i32 : i32, i32
  }
}

</mosaic_0001>

<bundles_post_ra>
// kernel: mul.4
= control target key start
LH: loop header
LB: loop body
LE: loop exit
PB: predicated region body
PF: predicated region fallthrough
CT: control target
= control target key end

     0   :  { %2 = vsyncpa [#allocation1], 0  ;;  %s129_s8 = smov [#allocation0]   ;;  %s179_s0 = inlined_call_operand.hbm [shape: f32[3,3,4,8], index: 0, kind: input, shape index: {}]   ;;  %s180_s1 = inlined_call_operand.vmem [shape: f32[36,8], index: 1, kind: output, shape index: {}]  }
   0x1   :  { %s6_s0 = sshll.u32 %s179_s0, 4  ;;  %s8_s9 = sshll.u32 %s129_s8, 4  ;;  %s7_s0 = int_to_ptr.hbm [resolvable:$true] %s6_s0  ;;  %s9_s9 = int_to_ptr.vmem [resolvable:$true] %s8_s9 }
   0x2   :  { %11 = dma.hbm_to_vmem [thread:$0]  %s7_s0, 576, %s9_s9, [#allocation1]  }
   0x3   :  { %127 = dma.done.wait [#allocation1], 576  }
   0x4   :  { %128 = vsyncadd [#allocation1], 4294966720  ;;  %v17_v0 = vld [vmem:[#allocation0 + $0x20] sm:$0xf]  ;;  %v21_v1 = vld [vmem:[#allocation0 + $0x1c] sm:$0xf] }
   0x5   :  { %v25_v2 = vld [vmem:[#allocation0 + $0x18] sm:$0xf]  ;;  %19 = vst [vmem:[#allocation2 + $0x10] sm:$0xf] %v17_v0  ;;  %v29_v3 = vld [vmem:[#allocation0 + $0x14] sm:$0xf] }
   0x6   :  { %23 = vst [vmem:[#allocation2 + $0x40] sm:$0xf] %v21_v1  ;;  %v33_v4 = vld [vmem:[#allocation0 + $0x10] sm:$0xf]  ;;  %v37_v5 = vld [vmem:[#allocation0 + $0xc] sm:$0xf] }
   0x7   :  { %27 = vst [vmem:[#allocation2 + $0x28] sm:$0xf] %v25_v2  ;;  %v41_v6 = vld [vmem:[#allocation0 + $0x8] sm:$0xf]  ;;  %v45_v7 = vld [vmem:[#allocation0 + $0x4] sm:$0xf] }
   0x8   :  { %31 = vst [vmem:[#allocation2 + $0x30] sm:$0xf] %v29_v3  ;;  %v48_v8 = vld [vmem:[#allocation0] sm:$0xf]  ;;  %vm51_vm0 = vcmask 64512  }
   0x9   :  { %35 = vst [vmem:[#allocation2 + $0x20] sm:$0xf] %v33_v4 }
   0xa   :  { %39 = vst [vmem:[#allocation2 + $0x18] sm:$0xf] %v37_v5 }
   0xb   :  { %43 = vst [vmem:[#allocation2] sm:$0xf] %v41_v6 }
   0xc   :  { %47 = vst [vmem:[#allocation2 + $0x8] sm:$0xf] %v45_v7  ;;  %v89_v16 = vld [vmem:[#allocation2 + $0x10] sm:$0xf]  }
   0xd   :  { %49 = vst [vmem:[#allocation2 + $0x38] sm:$0xf] %v48_v8  ;;  %v84_v9 = vld [vmem:[#allocation2 + $0x40] sm:$0xf]  }
   0xe   :  { %v79_v10 = vld [vmem:[#allocation2 + $0x28] sm:$0xf]   ;;  %100 = vst.msk [vmem:[%s180_s1 + $0x1c] sm:$0xf] %vm51_vm0, %v84_v9  }
   0xf   :  { %v74_v11 = vld [vmem:[#allocation2 + $0x30] sm:$0xf]   ;;  %99 = vst.msk [vmem:[%s180_s1 + $0x18] sm:$0xf] %vm51_vm0, %v79_v10  }
  0x10   :  { %v69_v12 = vld [vmem:[#allocation2 + $0x20] sm:$0xf]   ;;  %98 = vst.msk [vmem:[%s180_s1 + $0x14] sm:$0xf] %vm51_vm0, %v74_v11  }
  0x11   :  { %v64_v13 = vld [vmem:[#allocation2 + $0x18] sm:$0xf]   ;;  %97 = vst.msk [vmem:[%s180_s1 + $0x10] sm:$0xf] %vm51_vm0, %v69_v12  }
  0x12   :  { %v59_v14 = vld [vmem:[#allocation2] sm:$0xf]   ;;  %96 = vst.msk [vmem:[%s180_s1 + $0xc] sm:$0xf] %vm51_vm0, %v64_v13  }
  0x13   :  { %v54_v15 = vld [vmem:[#allocation2 + $0x8] sm:$0xf]   ;;  %95 = vst.msk [vmem:[%s180_s1 + $0x8] sm:$0xf] %vm51_vm0, %v59_v14  }
  0x14   :  { %v50_v17 = vld [vmem:[#allocation2 + $0x38] sm:$0xf]   ;;  %94 = vst.msk [vmem:[%s180_s1 + $0x4] sm:$0xf] %vm51_vm0, %v54_v15  }
  0x15   :  { %52 = vst.msk [vmem:[%s180_s1] sm:$0xf] %vm51_vm0, %v50_v17  }
  0x16   :  { %101 = vst.msk [vmem:[%s180_s1 + $0x20] sm:$0xf] %vm51_vm0, %v89_v16  }
  0x17   :  { %93 = vsyncpa [#allocation1], 1 }

// kernel: tile.18
= control target key start
LH: loop header
LB: loop body
LE: loop exit
PB: predicated region body
PF: predicated region fallthrough
CT: control target
= control target key end

     0   :  { %s28_s0 = inlined_call_operand.vmem [shape: f32[8], index: 0, kind: input, shape index: {}]   ;;  %s29_s1 = inlined_call_operand.vmem [shape: f32[16,8], index: 1, kind: output, shape index: {}]  }
   0x1   :  { %v4_v0 = vld [vmem:[%s28_s0] ss:$0 sm:$0xff] }
   0x2   :  { %5 = vst [vmem:[%s29_s1] sm:$0xff] %v4_v0 }
   0x3   :  { %8 = vst [vmem:[%s29_s1 + $0x8] sm:$0xff] %v4_v0 }

// kernel: tile.19
= control target key start
LH: loop header
LB: loop body
LE: loop exit
PB: predicated region body
PF: predicated region fallthrough
CT: control target
= control target key end

     0   :  { %s131_s10 = smov 120   ;;  %s132_s11 = smov 104   ;;  %vm3_vm0 = vcmask 64512   ;;  %vm9_vm1 = vcmask 1048512   ;;  %vm15_vm2 = vcmask 982912   ;;  %vm21_vm3 = vcmask 917312   ;;  %s207_s0 = inlined_call_operand.vmem [shape: f32[16,8], index: 0, kind: input, shape index: {}]   ;;  %s208_s1 = inlined_call_operand.vmem [shape: f32[1,128], index: 1, kind: output, shape index: {}]  }
   0x1   :  { %v101_v0 = vld [vmem:[%s207_s0 + $0xf] sm:$0x1]   ;;  %v103_v1 = vld [vmem:[%s207_s0 + $0xd] sm:$0x1]   ;;  %v105_v2 = vld [vmem:[%s207_s0 + $0xb] sm:$0x1]  }
   0x2   :  { %7 = vrot.lane.b32.xlu0 %v101_v0, %s131_s10  ;;  %19 = vrot.lane.b32.xlu1 %v103_v1, %s132_s11  ;;  %s133_s14 = smov 88   ;;  %v102_v3 = vld [vmem:[%s207_s0 + $0xe] sm:$0x1]   ;;  %v104_v4 = vld [vmem:[%s207_s0 + $0xc] sm:$0x1]   ;;  %s134_s19 = smov 112  }
   0x3   :  { %31 = vrot.lane.b32.xlu2 %v105_v2, %s133_s14  ;;  %s135_s20 = smov 96   ;;  %v106_v5 = vld [vmem:[%s207_s0 + $0xa] sm:$0x1]   ;;  %s136_s23 = smov 80   ;;  %v107_v6 = vld [vmem:[%s207_s0 + $0x9] sm:$0x1]  }
   0x4   :  { %v108_v7 = vld [vmem:[%s207_s0 + $0x8] sm:$0x1]   ;;  %s137_s28 = smov 72   ;;  %s138_s29 = smov 64   ;;  %v109_v8 = vld [vmem:[%s207_s0 + $0x7] sm:$0x1]  }
   0x5   :  { %s139_s3 = smov 56   ;;  %v110_v9 = vld [vmem:[%s207_s0 + $0x6] sm:$0x1]   ;;  %v111_v10 = vld [vmem:[%s207_s0 + $0x5] sm:$0x1]   ;;  %s140_s8 = smov 48  }
   0x6   :  { %s141_s9 = smov 40   ;;  %v112_v11 = vld [vmem:[%s207_s0 + $0x4] sm:$0x1]   ;;  %s142_s12 = smov 32   ;;  %v113_v12 = vld [vmem:[%s207_s0 + $0x3] sm:$0x1]  }
   0x7   :  { %v114_v13 = vld [vmem:[%s207_s0 + $0x2] sm:$0x1]   ;;  %s143_s17 = smov 24   ;;  %s144_s18 = smov 16   ;;  %v115_v14 = vld [vmem:[%s207_s0 + $0x1] sm:$0x1]  }
   0x8   :  { %s145_s21 = smov 8   ;;  %v2_v15 = vld [vmem:[%s207_s0] sm:$0x1]   ;;  %vm27_vm4 = vcmask 851712   ;;  %vm33_vm5 = vcmask 786112   ;;  %vm39_vm6 = vcmask 720512  }
   0x9   :  { %4 = vst.msk [vmem:[#allocation0] sm:$0x1] %vm3_vm0, %v2_v15   ;;  %vm45_vm7 = vcmask 654912   ;;  %vm51_vm8 = vcmask 589312   ;;  %vm57_vm9 = vcmask 523712   ;;  %vm63_vm10 = vcmask 458112  }
   0xa   :  { %13 = vrot.lane.b32.xlu0 %v102_v3, %s134_s19  ;;  %25 = vrot.lane.b32.xlu1 %v104_v4, %s135_s20  ;;  %vm69_vm11 = vcmask 392512   ;;  %vm75_vm12 = vcmask 326912   ;;  %vm81_vm13 = vcmask 261312   ;;  %vm87_vm14 = vcmask 195712  }
   0xb   :  { %37 = vrot.lane.b32.xlu2 %v106_v5, %s136_s23  ;;  %vm93_vm15 = vcmask 130112  }
  0x12   :  { %43 = vrot.lane.b32.xlu0 %v107_v6, %s137_s28  ;;  %49 = vrot.lane.b32.xlu1 %v108_v7, %s138_s29 }
  0x13   :  { %55 = vrot.lane.b32.xlu2 %v109_v8, %s139_s3 }
  0x1a   :  { %61 = vrot.lane.b32.xlu0 %v110_v9, %s140_s8  ;;  %67 = vrot.lane.b32.xlu1 %v111_v10, %s141_s9 }
  0x1b   :  { %73 = vrot.lane.b32.xlu2 %v112_v11, %s142_s12 }
  0x22   :  { %79 = vrot.lane.b32.xlu0 %v113_v12, %s143_s17  ;;  %85 = vrot.lane.b32.xlu1 %v114_v13, %s144_s18 }
  0x23   :  { %91 = vrot.lane.b32.xlu2 %v115_v14, %s145_s21 }
  0x5d   :  { %v32_v16 = vpop.permute.xlu2 %31  }
  0x65   :  { %v38_v17 = vpop.permute.xlu2 %37  }
  0x6d   :  { %v56_v18 = vpop.permute.xlu2 %55  }
  0x74   :  { %v8_v19 = vpop.permute.xlu0 %7   ;;  %v20_v20 = vpop.permute.xlu1 %19  }
  0x75   :  { %10 = vst.msk [vmem:[#allocation0] sm:$0x1] %vm9_vm1, %v8_v19   ;;  %v74_v21 = vpop.permute.xlu2 %73  }
  0x7c   :  { %v14_v22 = vpop.permute.xlu0 %13   ;;  %v26_v23 = vpop.permute.xlu1 %25  }
  0x7d   :  { %16 = vst.msk [vmem:[#allocation0] sm:$0x1] %vm15_vm2, %v14_v22   ;;  %v92_v24 = vpop.permute.xlu2 %91  }
  0x7e   :  { %22 = vst.msk [vmem:[#allocation0] sm:$0x1] %vm21_vm3, %v20_v20  }
  0x7f   :  { %28 = vst.msk [vmem:[#allocation0] sm:$0x1] %vm27_vm4, %v26_v23  }
  0x80   :  { %34 = vst.msk [vmem:[#allocation0] sm:$0x1] %vm33_vm5, %v32_v16  }
  0x81   :  { %40 = vst.msk [vmem:[#allocation0] sm:$0x1] %vm39_vm6, %v38_v17  }
  0x84   :  { %v44_v25 = vpop.permute.xlu0 %43   ;;  %v50_v26 = vpop.permute.xlu1 %49  }
  0x85   :  { %46 = vst.msk [vmem:[#allocation0] sm:$0x1] %vm45_vm7, %v44_v25  }
  0x86   :  { %52 = vst.msk [vmem:[#allocation0] sm:$0x1] %vm51_vm8, %v50_v26  }
  0x87   :  { %58 = vst.msk [vmem:[#allocation0] sm:$0x1] %vm57_vm9, %v56_v18  }
  0x8c   :  { %v62_v27 = vpop.permute.xlu0 %61   ;;  %v68_v28 = vpop.permute.xlu1 %67  }
  0x8d   :  { %64 = vst.msk [vmem:[#allocation0] sm:$0x1] %vm63_vm10, %v62_v27  }
  0x8e   :  { %70 = vst.msk [vmem:[#allocation0] sm:$0x1] %vm69_vm11, %v68_v28  }
  0x8f   :  { %76 = vst.msk [vmem:[#allocation0] sm:$0x1] %vm75_vm12, %v74_v21  }
  0x94   :  { %v80_v29 = vpop.permute.xlu0 %79   ;;  %v86_v30 = vpop.permute.xlu1 %85  }
  0x95   :  { %82 = vst.msk [vmem:[#allocation0] sm:$0x1] %vm81_vm13, %v80_v29  }
  0x96   :  { %88 = vst.msk [vmem:[#allocation0] sm:$0x1] %vm87_vm14, %v86_v30  }
  0x97   :  { %94 = vst.msk [vmem:[#allocation0] sm:$0x1] %vm93_vm15, %v92_v24  }
  0x9e   :  { %v97_v31 = vld [vmem:[#allocation0] sm:$0x1] }
  0x9f   :  { %100 = vst [vmem:[%s208_s1] sm:$0x1] %v97_v31 }

// kernel: _lambda_.3
= control target key start
LH: loop header
LB: loop body
LE: loop exit
PB: predicated region body
PF: predicated region fallthrough
CT: control target
= control target key end

     0   :  { %s106_s0 = inlined_call_operand.vmem [shape: f32[32,128], index: 0, kind: input, shape index: {}, may-alias: {0,3}]   ;;  %s107_s1 = inlined_call_operand.vmem [shape: f32[1,128], index: 1, kind: input, shape index: {}]   ;;  %s108_s2 = inlined_call_operand.vmem [shape: f32[1,128], index: 2, kind: input, shape index: {}]   ;;  %s109_s3 = inlined_call_operand.vmem [shape: f32[32,128], index: 3, kind: output, shape index: {}, may-alias: {0,3}]  }
   0x1   :  { %v14_v0 = vld [vmem:[%s106_s0] sm:$0xff]  ;;  %v15_v3 = vld [vmem:[%s106_s0 + $0x8] sm:$0xff]  ;;  %v16_v6 = vld [vmem:[%s106_s0 + $0x10] sm:$0xff] }
   0x2   :  { %v54_v1 = vld [vmem:[%s107_s1] ss:$0 sm:$0xff]  ;;  %v17_v7 = vld [vmem:[%s106_s0 + $0x18] sm:$0xff] }
   0x3   :  { %v55_v2 = vld [vmem:[%s108_s2] ss:$0 sm:$0xff]  ;;  %v22_v4 = vmul.f32 %v54_v1, %v14_v0  ;;  %v23_v5 = vmul.f32 %v54_v1, %v15_v3  ;;  %v24_v8 = vmul.f32 %v54_v1, %v16_v6  ;;  %v25_v9 = vmul.f32 %v54_v1, %v17_v7 }
   0x5   :  { %v30_v10 = vadd.f32 %v55_v2, %v22_v4  ;;  %v31_v11 = vadd.f32 %v55_v2, %v23_v5  ;;  %v32_v12 = vadd.f32 %v55_v2, %v24_v8  ;;  %v33_v13 = vadd.f32 %v55_v2, %v25_v9 }
   0x7   :  { %vm34_vm0 = vcmp.gt.f32.partialorder %v30_v10, 0.0  ;;  %v38_v14 = vmul.f32 0.01, %v30_v10  ;;  %vm35_vm1 = vcmp.gt.f32.partialorder %v31_v11, 0.0  ;;  %v39_v15 = vmul.f32 0.01, %v31_v11 }
   0x8   :  { %vm36_vm2 = vcmp.gt.f32.partialorder %v32_v12, 0.0  ;;  %v40_v16 = vmul.f32 0.01, %v32_v12  ;;  %vm37_vm3 = vcmp.gt.f32.partialorder %v33_v13, 0.0  ;;  %v41_v17 = vmul.f32 0.01, %v33_v13 }
   0x9   :  { %v42_v18 = vsel %vm34_vm0, %v30_v10, %v38_v14  ;;  %v43_v19 = vsel %vm35_vm1, %v31_v11, %v39_v15 }
   0xa   :  { %46 = vst [vmem:[%s109_s3] sm:$0xff] %v42_v18  ;;  %v44_v20 = vsel %vm36_vm2, %v32_v12, %v40_v16  ;;  %v45_v21 = vsel %vm37_vm3, %v33_v13, %v41_v17 }
   0xb   :  { %47 = vst [vmem:[%s109_s3 + $0x8] sm:$0xff] %v43_v19 }
   0xc   :  { %48 = vst [vmem:[%s109_s3 + $0x10] sm:$0xff] %v44_v20 }
   0xd   :  { %49 = vst [vmem:[%s109_s3 + $0x18] sm:$0xff] %v45_v21 }

// kernel: _lambda_.2
= control target key start
LH: loop header
LB: loop body
LE: loop exit
PB: predicated region body
PF: predicated region fallthrough
CT: control target
= control target key end

     0   :  { %vm365_vm0 = vcmask 523264   ;;  %s942_s1 = inlined_call_operand.vmem [shape: bf16[576,128], index: 1, kind: input, shape index: {}]   ;;  %s943_s0 = inlined_call_operand.vmem [shape: bf16[32,576], index: 0, kind: input, shape index: {}]   ;;  %s944_s2 = inlined_call_operand.vmem [shape: f32[32,128], index: 2, kind: output, shape index: {0}]   ;;  %s945_s3 = inlined_call_operand.vmem [shape: f32[1,8,128], index: 3, kind: output, shape index: {1}]   ;;  %s946_s4 = inlined_call_operand.vmem [shape: f32[1,8,128], index: 4, kind: output, shape index: {2}]  }
   0x1   :  { %v698_v0 = vld [vmem:[%s942_s1 + $0x38] sm:$0xff]  ;;  %v697_v4 = vld [vmem:[%s942_s1 + $0x30] sm:$0xff]  ;;  %v696_v8 = vld [vmem:[%s942_s1 + $0x28] sm:$0xff] }
   0x2   :  { %v706_v1 = vld [vmem:[%s942_s1 + $0x78] sm:$0xff]  ;;  %372 = vmatpush.bf16.msra.mxu0 %v698_v0  ;;  %v705_v5 = vld [vmem:[%s942_s1 + $0x70] sm:$0xff]  ;;  %v704_v9 = vld [vmem:[%s942_s1 + $0x68] sm:$0xff] }
   0x3   :  { %v714_v2 = vld [vmem:[%s942_s1 + $0xb8] sm:$0xff]  ;;  %391 = vmatpush.bf16.msra.mxu1 %v706_v1  ;;  %v713_v6 = vld [vmem:[%s942_s1 + $0xb0] sm:$0xff]  ;;  %v712_v10 = vld [vmem:[%s942_s1 + $0xa8] sm:$0xff] }
   0x4   :  { %v722_v3 = vld [vmem:[%s942_s1 + $0xf8] sm:$0xff]  ;;  %410 = vmatpush.bf16.msra.mxu2 %v714_v2  ;;  %v721_v7 = vld [vmem:[%s942_s1 + $0xf0] sm:$0xff]  ;;  %v720_v11 = vld [vmem:[%s942_s1 + $0xe8] sm:$0xff] }
   0x5   :  { %429 = vmatpush.bf16.msra.mxu3 %v722_v3  ;;  %v695_v12 = vld [vmem:[%s942_s1 + $0x20] sm:$0xff]  ;;  %v694_v16 = vld [vmem:[%s942_s1 + $0x18] sm:$0xff]  ;;  %v693_v20 = vld [vmem:[%s942_s1 + $0x10] sm:$0xff] }
   0x6   :  { %373 = vmatpush.bf16.msra.mxu0 %v697_v4  ;;  %v703_v13 = vld [vmem:[%s942_s1 + $0x60] sm:$0xff]  ;;  %v702_v17 = vld [vmem:[%s942_s1 + $0x58] sm:$0xff]  ;;  %v701_v21 = vld [vmem:[%s942_s1 + $0x50] sm:$0xff] }
   0x7   :  { %392 = vmatpush.bf16.msra.mxu1 %v705_v5  ;;  %v711_v14 = vld [vmem:[%s942_s1 + $0xa0] sm:$0xff]  ;;  %v710_v18 = vld [vmem:[%s942_s1 + $0x98] sm:$0xff]  ;;  %v709_v22 = vld [vmem:[%s942_s1 + $0x90] sm:$0xff] }
   0x8   :  { %411 = vmatpush.bf16.msra.mxu2 %v713_v6  ;;  %v719_v15 = vld [vmem:[%s942_s1 + $0xe0] sm:$0xff]  ;;  %v718_v19 = vld [vmem:[%s942_s1 + $0xd8] sm:$0xff]  ;;  %v717_v23 = vld [vmem:[%s942_s1 + $0xd0] sm:$0xff] }
   0x9   :  { %430 = vmatpush.bf16.msra.mxu3 %v721_v7  ;;  %v692_v24 = vld [vmem:[%s942_s1 + $0x8] sm:$0xff]  ;;  %v691_v28 = vld [vmem:[%s942_s1] sm:$0xff]  ;;  %v683_v33 = vld [vmem:[%s943_s0 + $0x10] sm:$0xf0] }
   0xa   :  { %374 = vmatpush.bf16.msra.mxu0 %v696_v8  ;;  %v700_v25 = vld [vmem:[%s942_s1 + $0x48] sm:$0xff]  ;;  %v699_v29 = vld [vmem:[%s942_s1 + $0x40] sm:$0xff]  ;;  %v499_v35 = vld [vmem:[%s943_s0 + $0x14] sm:$0xf0] }
   0xb   :  { %393 = vmatpush.bf16.msra.mxu1 %v704_v9  ;;  %v708_v26 = vld [vmem:[%s942_s1 + $0x88] sm:$0xff]  ;;  %v707_v30 = vld [vmem:[%s942_s1 + $0x80] sm:$0xff]  ;;  %v684_v37 = vld [vmem:[%s943_s0 + $0x18] sm:$0xf0] }
   0xc   :  { %412 = vmatpush.bf16.msra.mxu2 %v712_v10  ;;  %v716_v27 = vld [vmem:[%s942_s1 + $0xc8] sm:$0xff]  ;;  %v715_v31 = vld [vmem:[%s942_s1 + $0xc0] sm:$0xff]  ;;  %v726_v40 = vld [vmem:[%s942_s1 + $0x118] sm:$0xff] }
   0xd   :  { %431 = vmatpush.bf16.msra.mxu3 %v720_v11  ;;  %v497_v32 = vld [vmem:[%s943_s0] sm:$0xf]  ;;  %v681_v34 = vld [vmem:[%s943_s0 + $0x4] sm:$0xf]  ;;  %v505_v36 = vld [vmem:[%s943_s0 + $0x8] sm:$0xf] }
   0xe   :  { %375 = vmatpush.bf16.msra.mxu0 %v695_v12  ;;  %v682_v38 = vld [vmem:[%s943_s0 + $0xc] sm:$0xf]  ;;  %v507_v39 = vld [vmem:[%s943_s0 + $0x1c] sm:$0xf0]  ;;  %v498_v41 = vor.u32 %v683_v33, %v497_v32  ;;  %v502_v42 = vor.u32 %v681_v34, %v499_v35  ;;  %v506_v43 = vor.u32 %v684_v37, %v505_v36  ;;  %v725_v45 = vld [vmem:[%s942_s1 + $0x110] sm:$0xff] }
   0xf   :  { %394 = vmatpush.bf16.msra.mxu1 %v703_v13  ;;  %v510_v44 = vor.u32 %v682_v38, %v507_v39  ;;  %v724_v46 = vld [vmem:[%s942_s1 + $0x108] sm:$0xff]  ;;  %v723_v47 = vld [vmem:[%s942_s1 + $0x100] sm:$0xff]  ;;  %v688_v49 = vld [vmem:[%s943_s0 + $0x38] sm:$0xf0] }
  0x10   :  { %413 = vmatpush.bf16.msra.mxu2 %v711_v14  ;;  %v517_v48 = vld [vmem:[%s943_s0 + $0x28] sm:$0xf]  ;;  %v686_v50 = vld [vmem:[%s943_s0 + $0x2c] sm:$0xf]  ;;  %v519_v51 = vld [vmem:[%s943_s0 + $0x3c] sm:$0xf0] }
  0x11   :  { %432 = vmatpush.bf16.msra.mxu3 %v719_v15  ;;  %v525_v52 = vld [vmem:[%s943_s0 + $0x30] sm:$0xf]  ;;  %v689_v53 = vld [vmem:[%s943_s0 + $0x40] sm:$0xf0]  ;;  %v687_v54 = vld [vmem:[%s943_s0 + $0x34] sm:$0xf]  ;;  %v518_v56 = vor.u32 %v688_v49, %v517_v48  ;;  %v522_v57 = vor.u32 %v686_v50, %v519_v51 }
  0x12   :  { %376 = vmatpush.bf16.msra.mxu0 %v694_v16  ;;  %v527_v55 = vld [vmem:[%s943_s0 + $0x44] sm:$0xf0]  ;;  %v526_v58 = vor.u32 %v689_v53, %v525_v52  ;;  %v513_v60 = vld [vmem:[%s943_s0 + $0x10] sm:$0xf]  ;;  %v685_v61 = vld [vmem:[%s943_s0 + $0x20] sm:$0xf0] }
  0x13   :  { %395 = vmatpush.bf16.msra.mxu1 %v702_v17  ;;  %v530_v59 = vor.u32 %v687_v54, %v527_v55  ;;  %v533_v62 = vld [vmem:[%s943_s0 + $0x38] sm:$0xf]  ;;  %v690_v63 = vld [vmem:[%s943_s0 + $0x48] sm:$0xf0]  ;;  %v514_v0 = vor.u32 %v685_v61, %v513_v60 }
  0x14   :  { %414 = vmatpush.bf16.msra.mxu2 %v710_v18  ;;  %v534_v1 = vor.u32 %v690_v63, %v533_v62 }
  0x15   :  { %433 = vmatpush.bf16.msra.mxu3 %v718_v19 }
  0x16   :  { %377 = vmatpush.bf16.msra.mxu0 %v693_v20 }
  0x17   :  { %396 = vmatpush.bf16.msra.mxu1 %v701_v21 }
  0x18   :  { %415 = vmatpush.bf16.msra.mxu2 %v709_v22 }
  0x19   :  { %434 = vmatpush.bf16.msra.mxu3 %v717_v23 }
  0x1a   :  { %378 = vmatpush.bf16.msra.mxu0 %v692_v24 }
  0x1b   :  { %397 = vmatpush.bf16.msra.mxu1 %v700_v25 }
  0x1c   :  { %416 = vmatpush.bf16.msra.mxu2 %v708_v26 }
  0x1d   :  { %435 = vmatpush.bf16.msra.mxu3 %v716_v27 }
  0x1e   :  { %379 = vmatpush.bf16.msra.mxu0 %v691_v28 }
  0x1f   :  { %398 = vmatpush.bf16.msra.mxu1 %v699_v29 }
  0x20   :  { %417 = vmatpush.bf16.msra.mxu2 %v707_v30 }
  0x21   :  { %436 = vmatpush.bf16.msra.mxu3 %v715_v31  ;;  %380 = vmatmul.bf16.vlgmr.msra.gmra.mxu0 %v498_v41 }
  0x22   :  { %452 = vmatpush.bf16.msrb.mxu0 %v726_v40  ;;  %399 = vmatmul.bf16.vlgmr.msra.gmra.mxu1 %v502_v42 }
  0x23   :  { %727 = vmatpush.bf16.msrb.mxu1 %v726_v40  ;;  %418 = vmatmul.bf16.vlgmr.msra.gmra.mxu2 %v506_v43 }
  0x24   :  { %437 = vmatmul.bf16.vlgmr.msra.gmra.mxu3 %v510_v44 }
  0x26   :  { %453 = vmatpush.bf16.msrb.mxu0 %v725_v45 }
  0x27   :  { %728 = vmatpush.bf16.msrb.mxu1 %v725_v45 }
  0x2a   :  { %454 = vmatpush.bf16.msrb.mxu0 %v724_v46 }
  0x2b   :  { %729 = vmatpush.bf16.msrb.mxu1 %v724_v46 }
  0x2e   :  { %455 = vmatpush.bf16.msrb.mxu0 %v723_v47 }
  0x2f   :  { %730 = vmatpush.bf16.msrb.mxu1 %v723_v47 }
  0x31   :  { %385 = vmatmul.bf16.gmra.mxu0 %v518_v56 }
  0x32   :  { %404 = vmatmul.bf16.gmra.mxu1 %v522_v57 }
  0x33   :  { %423 = vmatmul.bf16.gmra.mxu2 %v526_v58 }
  0x34   :  { %442 = vmatmul.bf16.gmra.mxu3 %v530_v59 }
  0x41   :  { %679 = vmatmul.msk.bf16.vlgmr.msrb.gmra.mxu0 %vm365_vm0, %v514_v0 }
  0x42   :  { %680 = vmatmul.msk.bf16.vlgmr.msrb.gmra.mxu1 %vm365_vm0, %v534_v1 }
  0x9e   :  { %v381_v2 = vpop.f32.mrf.mxu0 }
  0x9f   :  { %v400_v3 = vpop.f32.mrf.mxu1 }
  0xa0   :  { %v401_v15 = vadd.f32 %v400_v3, %v381_v2 }
  0xa6   :  { %v419_v4 = vpop.f32.mrf.mxu2  ;;  %v383_v6 = vpop.f32.mrf.mxu0 }
  0xa7   :  { %v438_v5 = vpop.f32.mrf.mxu3  ;;  %v402_v7 = vpop.f32.mrf.mxu1  ;;  %v420_v18 = vadd.f32 %v419_v4, %v401_v15 }
  0xa8   :  { %v403_v25 = vadd.f32 %v402_v7, %v383_v6 }
  0xa9   :  { %v439_v20 = vadd.f32 %v438_v5, %v420_v18 }
  0xae   :  { %v421_v8 = vpop.f32.mrf.mxu2  ;;  %v386_v10 = vpop.f32.mrf.mxu0 }
  0xaf   :  { %v440_v9 = vpop.f32.mrf.mxu3  ;;  %v405_v11 = vpop.f32.mrf.mxu1  ;;  %v422_v29 = vadd.f32 %v421_v8, %v403_v25 }
  0xb0   :  { %v406_v16 = vadd.f32 %v405_v11, %v386_v10 }
  0xb1   :  { %v441_v32 = vadd.f32 %v440_v9, %v422_v29 }
  0xb6   :  { %v424_v12 = vpop.f32.mrf.mxu2  ;;  %v388_v13 = vpop.f32.mrf.mxu0 }
  0xb7   :  { %v407_v14 = vpop.f32.mrf.mxu1  ;;  %v443_v17 = vpop.f32.mrf.mxu3  ;;  %v425_v19 = vadd.f32 %v424_v12, %v406_v16 }
  0xb8   :  { %v408_v26 = vadd.f32 %v407_v14, %v388_v13 }
  0xb9   :  { %v444_v21 = vadd.f32 %v443_v17, %v425_v19 }
  0xbe   :  { %v426_v22 = vpop.f32.mrf.mxu2  ;;  %v457_v23 = vpop.f32.mrf.mxu0 }
  0xbf   :  { %v462_v24 = vpop.f32.mrf.mxu1  ;;  %v458_v27 = vadd.f32 %v457_v23, %v439_v20  ;;  %v427_v30 = vadd.f32 %v426_v22, %v408_v26  ;;  %v445_v31 = vpop.f32.mrf.mxu3 }
  0xc0   :  { %v463_v28 = vadd.f32 %v462_v24, %v444_v21 }
  0xc1   :  { %467 = vst [vmem:[%s944_s2] sm:$0xff] %v458_v27  ;;  %v446_v33 = vadd.f32 %v445_v31, %v427_v30  ;;  %v475_v38 = vmul.f32 %v458_v27, %v458_v27 }
  0xc2   :  { %469 = vst [vmem:[%s944_s2 + $0x10] sm:$0xff] %v463_v28  ;;  %v477_v41 = vmul.f32 %v463_v28, %v463_v28 }
  0xc6   :  { %v459_v34 = vpop.f32.mrf.mxu0 }
  0xc7   :  { %v464_v35 = vpop.f32.mrf.mxu1  ;;  %v460_v36 = vadd.f32 %v459_v34, %v441_v32 }
  0xc8   :  { %v465_v37 = vadd.f32 %v464_v35, %v446_v33 }
  0xc9   :  { %468 = vst [vmem:[%s944_s2 + $0x8] sm:$0xff] %v460_v36  ;;  %v471_v39 = vadd.f32 %v460_v36, %v458_v27  ;;  %v476_v40 = vmul.f32 %v460_v36, %v460_v36 }
  0xca   :  { %470 = vst [vmem:[%s944_s2 + $0x18] sm:$0xff] %v465_v37  ;;  %v478_v45 = vmul.f32 %v465_v37, %v465_v37 }
  0xcb   :  { %v479_v42 = vadd.f32 %v476_v40, %v475_v38  ;;  %v472_v43 = vadd.f32 %v471_v39, %v463_v28 }
  0xcd   :  { %v473_v44 = vadd.f32 %v472_v43, %v465_v37  ;;  %v480_v46 = vadd.f32 %v479_v42, %v477_v41 }
  0xcf   :  { %474 = vst [vmem:[%s945_s3] sm:$0xff] %v473_v44  ;;  %v481_v47 = vadd.f32 %v480_v46, %v478_v45 }
  0xd1   :  { %482 = vst [vmem:[%s946_s4] sm:$0xff] %v481_v47 }

</bundles_post_ra>
